<compile_context>
chip_gen: v7x
topology: tpu7x:2x2x1
jax: 0.10.0
libtpu: 0.0.40
codegen_flags: <defaults>
</compile_context>

<pallas_src>
import functools

import jax
import jax.numpy as jnp
from jax import lax
from jax.experimental import pallas as pl
from jax.experimental.pallas import tpu as pltpu

EPS = 1e-5

# MXU operand dtype. bf16 hits the native bf16 MXU path on v6e/v7x and halves
# operand DMA bytes; accumulation (preferred_element_type) and all BN / ReLU /
# residual math stay float32.  Set to jnp.float32 for bit-closer numerics.
MM_DTYPE = jnp.bfloat16


# ---------------------------- kernels ---------------------------------------
def _conv_slab(ym, shift_ref, m_ref):
    """3x3 'SAME' conv of a lane-dense slab via block-banded matmuls.

    ym        : (R, WC) MM_DTYPE slab, R = bt*H rows, WC = W*C lanes.
    shift_ref : (2, R, R) MM_DTYPE per-sample row-shift matrices
                [0]: row r <- input row r-1 (zero where h == 0)
                [1]: row r <- input row r+1 (zero where h == H-1)
    m_ref     : (3, WC, WC) MM_DTYPE block-banded weights for dy = -1, 0, +1.
    Returns   : (R, WC) float32 pre-BN conv output.
    """
    # Row shifts as exact 0/1 matmuls (tiny MXU work, no relayout, no masks).
    dn = jnp.dot(shift_ref[0], ym,
                 preferred_element_type=jnp.float32).astype(MM_DTYPE)
    up = jnp.dot(shift_ref[1], ym,
                 preferred_element_type=jnp.float32).astype(MM_DTYPE)
    # Three 256-wide banded matmuls, f32 accumulation.
    acc = jnp.dot(dn, m_ref[0], preferred_element_type=jnp.float32)
    acc += jnp.dot(ym, m_ref[1], preferred_element_type=jnp.float32)
    acc += jnp.dot(up, m_ref[2], preferred_element_type=jnp.float32)
    return acc


def _store_stats(st_ref, acc):
    # Two direct lane-dense (1, WC) stores: no concat, no cross-sublane move.
    st_ref[:, 0:1, :] = jnp.sum(acc, axis=0, keepdims=True)[None]
    st_ref[:, 1:2, :] = jnp.sum(acc * acc, axis=0, keepdims=True)[None]


def _conv1_kernel(x_ref, shift_ref, m1_ref, s1_ref, st_ref):
    """conv1 on the input slab + BN1 partial [sum, sum_sq] statistics."""
    acc = _conv_slab(x_ref[...], shift_ref, m1_ref)
    _store_stats(st_ref, acc)
    s1_ref[...] = acc.astype(s1_ref.dtype)


def _bn1_conv2_kernel(s1_ref, a1_ref, b1_ref, shift_ref, m2_ref, s2_ref, st_ref):
    """BN1 (global scale/shift) + ReLU, conv2, BN2 partial statistics."""
    y = jnp.maximum(s1_ref[...].astype(jnp.float32) * a1_ref[...] + b1_ref[...],
                    0.0)
    acc = _conv_slab(y.astype(MM_DTYPE), shift_ref, m2_ref)
    _store_stats(st_ref, acc)
    s2_ref[...] = acc                      # keep f32 for the XLA epilogue


# ---------------------------- wrapper helpers --------------------------------
def _banded_weights(w_hwio, Wd):
    """(3, 3, Cin, Cout) HWIO conv weights -> (3, Wd*Cin, Wd*Cout) banded mats.

    M_ky[(w')*Cin + ci, w*Cout + co] = w[ky, kx, ci, co] with w' = w + (kx-1),
    zero outside the band (which also encodes the W-boundary zero padding).
    """
    mats = []
    for ky in range(3):
        m = None
        for kx in range(3):
            # S[w', w] = 1 iff w' = w + (kx - 1)
            shift = jnp.eye(Wd, k=-(kx - 1), dtype=jnp.float32)
            blk = jnp.kron(shift, w_hwio[ky, kx].astype(jnp.float32))
            m = blk if m is None else m + blk
        mats.append(m)
    return jnp.stack(mats, axis=0).astype(MM_DTYPE)


def _row_shift_mats(bt, H):
    """Per-sample row-shift matrices (2, bt*H, bt*H) with H-boundary zeroing."""
    R = bt * H
    r = jnp.arange(R)
    h = r % H
    dn = ((r[:, None] - 1 == r[None, :]) & (h != 0)[:, None])
    up = ((r[:, None] + 1 == r[None, :]) & (h != H - 1)[:, None])
    return jnp.stack([dn, up], axis=0).astype(MM_DTYPE)


def _bn_affine(st, gamma, beta, n, W, C):
    """Combine per-tile [sum, sum_sq] partials -> BN scale/shift (train stats)."""
    st = st.reshape(-1, 2, W, C)
    s = jnp.sum(st[:, 0], axis=(0, 1))
    ss = jnp.sum(st[:, 1], axis=(0, 1))
    mean = s / n
    var = jnp.maximum(ss / n - mean * mean, 0.0)
    scale = gamma.astype(jnp.float32) * lax.rsqrt(var + EPS)
    shift = beta.astype(jnp.float32) - mean * scale
    return scale, shift


# ---------------------------- wrapper ----------------------------------------
def basic_block(x_nchw, w1_hwio, w2_hwio, gamma1, beta1, gamma2, beta2,
                *, batch_tile=2):
    """x_nchw: (B, C, H, W) float32. Returns (B, C, H, W) float32."""
    B, Cin, H, W = x_nchw.shape
    Cout = w1_hwio.shape[-1]
    assert Cin == Cout, "residual path (downsample=None) needs inplanes==planes"
    C = Cout
    bt = batch_tile
    assert B % bt == 0, "batch must be divisible by the batch tile"
    assert (bt * H) % 8 == 0, "batch_tile*H must be a multiple of 8 (sublanes)"
    nb = B // bt                      # keep nb >= 2 so v7x's 2 TCs both work
    R = bt * H                        # slab rows per grid step
    WC = W * C                        # lane-dense width (256 here)
    n = B * H * W                     # BN reduction size over (N, H, W)
    f32 = jnp.float32
    mmb = jnp.dtype(MM_DTYPE).itemsize

    # Layout glue (XLA): NCHW -> NHWC, lane-dense (B*H, W*C) slab view.
    x_nhwc = jnp.transpose(x_nchw, (0, 2, 3, 1)).astype(f32)
    x_slab = x_nhwc.reshape(B * H, WC).astype(MM_DTYPE)

    shift_mats = _row_shift_mats(bt, H)          # (2, R, R)
    m1 = _banded_weights(w1_hwio, W)             # (3, WC, WC)
    m2 = _banded_weights(w2_hwio, W)             # (3, WC, WC)

    # Per-step VMEM footprint (pass 2, the larger one): slab in/out + M2 +
    # shift mats + BN vectors + stats ~ 0.5 MiB; ~1 MiB double-buffered.
    # 16 MiB leaves >10x headroom and stays far below v7x's 64 MiB VMEM.
    cparams = pltpu.CompilerParams(dimension_semantics=("parallel",),
                                   vmem_limit_bytes=16 * 1024 * 1024)

    # ---- pass 1: conv1 (banded slab matmuls) + BN1 partial stats ------------
    ce1 = pl.CostEstimate(
        flops=6 * B * H * WC * WC + 4 * B * H * R * WC + 4 * B * H * WC,
        transcendentals=0,
        bytes_accessed=mmb * (2 * B * H * WC + 3 * WC * WC + 2 * R * R)
        + 4 * nb * 2 * WC)
    s1, st1 = pl.pallas_call(
        _conv1_kernel,
        out_shape=(jax.ShapeDtypeStruct((B * H, WC), MM_DTYPE),
                   jax.ShapeDtypeStruct((nb, 2, WC), f32)),
        grid=(nb,),
        in_specs=[pl.BlockSpec((R, WC), lambda i: (i, 0)),
                  pl.BlockSpec((2, R, R), lambda i: (0, 0, 0)),
                  pl.BlockSpec((3, WC, WC), lambda i: (0, 0, 0))],
        out_specs=(pl.BlockSpec((R, WC), lambda i: (i, 0)),
                   pl.BlockSpec((1, 2, WC), lambda i: (i, 0, 0))),
        compiler_params=cparams,
        cost_estimate=ce1,
    )(x_slab, shift_mats, m1)

    scale1, shift1 = _bn_affine(st1, gamma1, beta1, n, W, C)
    a1 = jnp.tile(scale1, W)[None, :]            # (1, WC) lane-dense
    b1 = jnp.tile(shift1, W)[None, :]

    # ---- pass 2: BN1 + ReLU + conv2 + BN2 partial stats ----------------------
    ce2 = pl.CostEstimate(
        flops=6 * B * H * WC * WC + 4 * B * H * R * WC + 8 * B * H * WC,
        transcendentals=0,
        bytes_accessed=mmb * (B * H * WC + 3 * WC * WC + 2 * R * R)
        + 4 * (B * H * WC + 2 * WC + nb * 2 * WC))
    s2, st2 = pl.pallas_call(
        _bn1_conv2_kernel,
        out_shape=(jax.ShapeDtypeStruct((B * H, WC), f32),
                   jax.ShapeDtypeStruct((nb, 2, WC), f32)),
        grid=(nb,),
        in_specs=[pl.BlockSpec((R, WC), lambda i: (i, 0)),
                  pl.BlockSpec((1, WC), lambda i: (0, 0)),
                  pl.BlockSpec((1, WC), lambda i: (0, 0)),
                  pl.BlockSpec((2, R, R), lambda i: (0, 0, 0)),
                  pl.BlockSpec((3, WC, WC), lambda i: (0, 0, 0))],
        out_specs=(pl.BlockSpec((R, WC), lambda i: (i, 0)),
                   pl.BlockSpec((1, 2, WC), lambda i: (i, 0, 0))),
        compiler_params=cparams,
        cost_estimate=ce2,
    )(s1, a1, b1, shift_mats, m2)

    # ---- epilogue (plain XLA): BN2 + residual add + ReLU + NCHW transpose ----
    scale2, shift2 = _bn_affine(st2, gamma2, beta2, n, W, C)
    out_nhwc = jnp.maximum(s2.reshape(B, H, W, C) * scale2 + shift2 + x_nhwc,
                           0.0)
    return jnp.transpose(out_nhwc, (0, 3, 1, 2))


# ---------------- pure-JAX reference (for correctness check) ----------------
def _bn_train(x_nhwc, gamma, beta):
    mean = jnp.mean(x_nhwc, axis=(0, 1, 2), keepdims=True)
    var = jnp.mean((x_nhwc - mean) ** 2, axis=(0, 1, 2), keepdims=True)
    return gamma * (x_nhwc - mean) * lax.rsqrt(var + EPS) + beta


def basic_block_ref(x_nchw, w1_hwio, w2_hwio, gamma1, beta1, gamma2, beta2):
    x = jnp.transpose(x_nchw, (0, 2, 3, 1)).astype(jnp.float32)
    dn = ('NHWC', 'HWIO', 'NHWC')
    out = lax.conv_general_dilated(x, w1_hwio, (1, 1), 'SAME',
                                   dimension_numbers=dn)
    out = jnp.maximum(_bn_train(out, gamma1, beta1), 0.0)
    out = lax.conv_general_dilated(out, w2_hwio, (1, 1), 'SAME',
                                   dimension_numbers=dn)
    out = _bn_train(out, gamma2, beta2)
    out = jnp.maximum(out + x, 0.0)
    return jnp.transpose(out, (0, 3, 1, 2))


if __name__ == "__main__":
    # Small ResNet-20-like block: inplanes == planes == 16, stride 1.
    B, C, H, W = 4, 16, 16, 16
    key = jax.random.PRNGKey(0)
    kx, k1, k2, kg1, kb1, kg2, kb2 = jax.random.split(key, 7)

    x = jax.random.normal(kx, (B, C, H, W), jnp.float32)
    # conv weights in HWIO layout (equiv. to permuted PyTorch OIHW weights)
    w1 = jax.random.normal(k1, (3, 3, C, C), jnp.float32) * 0.1
    w2 = jax.random.normal(k2, (3, 3, C, C), jnp.float32) * 0.1
    gamma1 = 1.0 + 0.1 * jax.random.normal(kg1, (C,), jnp.float32)
    beta1 = 0.1 * jax.random.normal(kb1, (C,), jnp.float32)
    gamma2 = 1.0 + 0.1 * jax.random.normal(kg2, (C,), jnp.float32)
    beta2 = 0.1 * jax.random.normal(kb2, (C,), jnp.float32)

    out = jax.block_until_ready(
        basic_block(x, w1, w2, gamma1, beta1, gamma2, beta2, batch_tile=2))
    ref = jax.block_until_ready(
        basic_block_ref(x, w1, w2, gamma1, beta1, gamma2, beta2))

    assert out.shape == (B, C, H, W)
    err = float(jnp.max(jnp.abs(out - ref)))
    # bf16 MXU operands (f32 accumulation) -> relaxed tolerance vs f32 ref.
    assert jnp.allclose(out, ref, atol=5e-2, rtol=5e-2), f"max err {err}"
    print("KERNEL_OK")
</pallas_src>

<mosaic_0001>
module attributes {stable_mosaic.version = 11 : i64} {
  func.func @_conv1_kernel(%arg0: i32, %arg1: memref<32x256xbf16, #tpu.memory_space<vmem>>, %arg2: memref<2x32x32xbf16, #tpu.memory_space<vmem>>, %arg3: memref<3x256x256xbf16, #tpu.memory_space<vmem>>, %arg4: memref<32x256xbf16, #tpu.memory_space<vmem>>, %arg5: memref<1x2x256xf32, #tpu.memory_space<vmem>>) attributes {dimension_semantics = [#tpu.dimension_semantics<parallel>], iteration_bounds = array<i64: 2>, scalar_prefetch = 0 : i64, scratch_operands = 0 : i64, tpu.core_type = #tpu.core_type<tc>, window_params = [{transform_indices = @transform_0, window_bounds = array<i64: 32, 256>}, {pipeline_mode = #tpu.pipeline_mode<synchronous>, transform_indices = @transform_1, window_bounds = array<i64: 2, 32, 32>}, {pipeline_mode = #tpu.pipeline_mode<synchronous>, transform_indices = @transform_2, window_bounds = array<i64: 3, 256, 256>}, {transform_indices = @transform_3, window_bounds = array<i64: 32, 256>}, {transform_indices = @transform_4, window_bounds = array<i64: 1, 2, 256>}]} {
    %c0 = arith.constant 0 : index
    %c0_0 = arith.constant 0 : index
    %0 = vector.load %arg1[%c0, %c0_0] : memref<32x256xbf16, #tpu.memory_space<vmem>>, vector<32x256xbf16>
    %c0_1 = arith.constant 0 : index
    %c0_2 = arith.constant 0 : index
    %c0_3 = arith.constant 0 : index
    %1 = vector.load %arg2[%c0_1, %c0_2, %c0_3] : memref<2x32x32xbf16, #tpu.memory_space<vmem>>, vector<1x32x32xbf16>
    %2 = vector.shape_cast %1 : vector<1x32x32xbf16> to vector<32x32xbf16>
    %cst = arith.constant dense<0.000000e+00> : vector<32x256xf32>
    %3 = tpu.matmul %2, %0, %cst {dimension_numbers = #tpu.dot_dimension_numbers<[1], [0], [0], [1], [0, 0, 1, 1], [], []>} : vector<32x32xbf16>, vector<32x256xbf16>, vector<32x256xf32> -> vector<32x256xf32>
    %4 = arith.truncf %3 : vector<32x256xf32> to vector<32x256xbf16>
    %c1 = arith.constant 1 : index
    %c0_4 = arith.constant 0 : index
    %c0_5 = arith.constant 0 : index
    %5 = vector.load %arg2[%c1, %c0_4, %c0_5] : memref<2x32x32xbf16, #tpu.memory_space<vmem>>, vector<1x32x32xbf16>
    %6 = vector.shape_cast %5 : vector<1x32x32xbf16> to vector<32x32xbf16>
    %cst_6 = arith.constant dense<0.000000e+00> : vector<32x256xf32>
    %7 = tpu.matmul %6, %0, %cst_6 {dimension_numbers = #tpu.dot_dimension_numbers<[1], [0], [0], [1], [0, 0, 1, 1], [], []>} : vector<32x32xbf16>, vector<32x256xbf16>, vector<32x256xf32> -> vector<32x256xf32>
    %8 = arith.truncf %7 : vector<32x256xf32> to vector<32x256xbf16>
    %c0_7 = arith.constant 0 : index
    %c0_8 = arith.constant 0 : index
    %c0_9 = arith.constant 0 : index
    %9 = vector.load %arg3[%c0_7, %c0_8, %c0_9] : memref<3x256x256xbf16, #tpu.memory_space<vmem>>, vector<1x256x256xbf16>
    %10 = vector.shape_cast %9 : vector<1x256x256xbf16> to vector<256x256xbf16>
    %cst_10 = arith.constant dense<0.000000e+00> : vector<32x256xf32>
    %11 = tpu.matmul %4, %10, %cst_10 {dimension_numbers = #tpu.dot_dimension_numbers<[1], [0], [0], [1], [0, 0, 1, 1], [], []>} : vector<32x256xbf16>, vector<256x256xbf16>, vector<32x256xf32> -> vector<32x256xf32>
    %c1_11 = arith.constant 1 : index
    %c0_12 = arith.constant 0 : index
    %c0_13 = arith.constant 0 : index
    %12 = vector.load %arg3[%c1_11, %c0_12, %c0_13] : memref<3x256x256xbf16, #tpu.memory_space<vmem>>, vector<1x256x256xbf16>
    %13 = vector.shape_cast %12 : vector<1x256x256xbf16> to vector<256x256xbf16>
    %cst_14 = arith.constant dense<0.000000e+00> : vector<32x256xf32>
    %14 = tpu.matmul %0, %13, %cst_14 {dimension_numbers = #tpu.dot_dimension_numbers<[1], [0], [0], [1], [0, 0, 1, 1], [], []>} : vector<32x256xbf16>, vector<256x256xbf16>, vector<32x256xf32> -> vector<32x256xf32>
    %15 = arith.addf %11, %14 : vector<32x256xf32>
    %c2 = arith.constant 2 : index
    %c0_15 = arith.constant 0 : index
    %c0_16 = arith.constant 0 : index
    %16 = vector.load %arg3[%c2, %c0_15, %c0_16] : memref<3x256x256xbf16, #tpu.memory_space<vmem>>, vector<1x256x256xbf16>
    %17 = vector.shape_cast %16 : vector<1x256x256xbf16> to vector<256x256xbf16>
    %cst_17 = arith.constant dense<0.000000e+00> : vector<32x256xf32>
    %18 = tpu.matmul %8, %17, %cst_17 {dimension_numbers = #tpu.dot_dimension_numbers<[1], [0], [0], [1], [0, 0, 1, 1], [], []>} : vector<32x256xbf16>, vector<256x256xbf16>, vector<32x256xf32> -> vector<32x256xf32>
    %19 = arith.addf %15, %18 : vector<32x256xf32>
    %cst_18 = arith.constant dense<0.000000e+00> : vector<256xf32>
    %20 = vector.multi_reduction <add>, %19, %cst_18 [0] : vector<32x256xf32> to vector<256xf32>
    %21 = vector.shape_cast %20 : vector<256xf32> to vector<1x256xf32>
    %22 = vector.shape_cast %21 : vector<1x256xf32> to vector<1x1x256xf32>
    %c0_19 = arith.constant 0 : index
    %c0_20 = arith.constant 0 : index
    %c0_21 = arith.constant 0 : index
    %23 = vector.load %arg5[%c0_19, %c0_20, %c0_21] : memref<1x2x256xf32, #tpu.memory_space<vmem>>, vector<1x1x256xf32>
    tpu.vector_store %arg5[%c0_19, %c0_20, %c0_21], %22 {strides = array<i32>} : memref<1x2x256xf32, #tpu.memory_space<vmem>>, vector<1x1x256xf32>,
    %24 = arith.mulf %19, %19 : vector<32x256xf32>
    %cst_22 = arith.constant dense<0.000000e+00> : vector<256xf32>
    %25 = vector.multi_reduction <add>, %24, %cst_22 [0] : vector<32x256xf32> to vector<256xf32>
    %26 = vector.shape_cast %25 : vector<256xf32> to vector<1x256xf32>
    %27 = vector.shape_cast %26 : vector<1x256xf32> to vector<1x1x256xf32>
    %c0_23 = arith.constant 0 : index
    %c1_24 = arith.constant 1 : index
    %c0_25 = arith.constant 0 : index
    %28 = vector.load %arg5[%c0_23, %c1_24, %c0_25] : memref<1x2x256xf32, #tpu.memory_space<vmem>>, vector<1x1x256xf32>
    tpu.vector_store %arg5[%c0_23, %c1_24, %c0_25], %27 {strides = array<i32>} : memref<1x2x256xf32, #tpu.memory_space<vmem>>, vector<1x1x256xf32>,
    %29 = arith.truncf %19 : vector<32x256xf32> to vector<32x256xbf16>
    %c0_26 = arith.constant 0 : index
    %c0_27 = arith.constant 0 : index
    %30 = vector.load %arg4[%c0_26, %c0_27] : memref<32x256xbf16, #tpu.memory_space<vmem>>, vector<32x256xbf16>
    tpu.vector_store %arg4[%c0_26, %c0_27], %29 {strides = array<i32>} : memref<32x256xbf16, #tpu.memory_space<vmem>>, vector<32x256xbf16>,
    return
  }
  func.func @transform_0(%arg0: i32) -> (i32, i32) {
    %c0_i32 = arith.constant 0 : i32
    %c0_i32_0 = arith.constant 0 : i32
    return %arg0, %c0_i32 : i32, i32
  }
  func.func @transform_1(%arg0: i32) -> (i32, i32, i32) {
    %c0_i32 = arith.constant 0 : i32
    %c0_i32_0 = arith.constant 0 : i32
    %c0_i32_1 = arith.constant 0 : i32
    %c0_i32_2 = arith.constant 0 : i32
    return %c0_i32, %c0_i32_0, %c0_i32_1 : i32, i32, i32
  }
  func.func @transform_2(%arg0: i32) -> (i32, i32, i32) {
    %c0_i32 = arith.constant 0 : i32
    %c0_i32_0 = arith.constant 0 : i32
    %c0_i32_1 = arith.constant 0 : i32
    %c0_i32_2 = arith.constant 0 : i32
    return %c0_i32, %c0_i32_0, %c0_i32_1 : i32, i32, i32
  }
  func.func @transform_3(%arg0: i32) -> (i32, i32) {
    %c0_i32 = arith.constant 0 : i32
    %c0_i32_0 = arith.constant 0 : i32
    return %arg0, %c0_i32 : i32, i32
  }
  func.func @transform_4(%arg0: i32) -> (i32, i32, i32) {
    %c0_i32 = arith.constant 0 : i32
    %c0_i32_0 = arith.constant 0 : i32
    %c0_i32_1 = arith.constant 0 : i32
    return %arg0, %c0_i32, %c0_i32_0 : i32, i32, i32
  }
}

</mosaic_0001>

<bundles_post_ra>
// kernel: tpu_custom_call.1
= control target key start
LH: loop header
LB: loop body
LE: loop exit
PB: predicated region body
PF: predicated region fallthrough
CT: control target
= control target key end

     0   :  { %10 = vsyncpa [#allocation3], 0  ;;  %s2386_s0 = inlined_call_operand.hbm [shape: bf16[64,256], index: 0, kind: input, shape index: {}]   ;;  %s2387_s1 = inlined_call_operand.hbm [shape: bf16[2,32,32], index: 1, kind: input, shape index: {}]   ;;  %s2388_s2 = inlined_call_operand.hbm [shape: bf16[3,256,256], index: 2, kind: input, shape index: {}]   ;;  %s2389_s3 = inlined_call_operand.hbm [shape: bf16[64,256], index: 3, kind: output, shape index: {0}]   ;;  %s2390_s4 = inlined_call_operand.hbm [shape: f32[2,2,256], index: 4, kind: output, shape index: {1}]  }
   0x1   :  { %12 = vsyncpa [#allocation3 + $0x1], 0 }
   0x2   :  { %13 = vsyncpa [#allocation6], 0 }
   0x3   :  { %14 = vsyncpa [#allocation4], 0 }
   0x4   :  { %16 = vsyncpa [#allocation4 + $0x1], 0 }
   0x5   :  { %17 = vsyncpa [#allocation10], 0 }
   0x6   :  { %19 = vsyncpa [#allocation10 + $0x1], 0  ;;  %s2082_s15 = smov 0   ;;  %s2084_s16 = smov 0  }
   0x7   :  { %s2086_s17 = smov 0   ;;  %s2088_s18 = smov 0  }
   0x8 LB: > { %s2103_s19 = sadd.s32 4294967295, %s2042_s18   ;;  %s1458_s20 = sadd.s32 4294967294, %s2042_s18   ;;  %s2042_s18 = sphi %s2088_s18, %s2410_s18   ;;  %s2038_s17 = sphi %s2086_s17, %s2409_s17   ;;  %s2034_s16 = sphi %s2084_s16, %s2408_s16   ;;  %s2030_s15 = sphi %s2082_s15, %s2407_s15  }
   0x9   : > { %p45_p0 = scmp.ne.s32.totalorder %s2034_s16, %s2030_s15  ;;  %p2391_p1 = scmp.eq.s32.totalorder %s2103_s19, 0 }
   0xa   : > { %p117_p3 = scmp.eq.s32.totalorder %s1458_s20, 1  ;;  %p1459_p5 = scmp.ge.s32.totalorder %s2042_s18, 1 }
   0xb   : > { %p2112_p4 = por %p2391_p1, %p45_p0  ;;  %p150_p7 = scmp.lt.s32.totalorder %s2042_s18, 3 }
   0xc   : > { %p2117_p6 = por %p117_p3, %p45_p0  ;;  %s2044_s24 = smov [#allocation5]  }
   0xd   : > { %s2394_s21 = scalar_select %p2112_p4, 1, 0 }
   0xe   : > { %s2395_s22 = scalar_select %p2117_p6, 1, 0 }
   0xf   : > { %p2122_p8 = pnand %p1459_p5, %p150_p7  ;;  %s162_s25 = sshll.u32 %s2044_s24, 4  ;;  %s2126_s25 = int_to_ptr.vmem [resolvable:$true] %s162_s25 }
  0x10   : > { %s2045_s27 = smov [#allocation7]   ;;  %s1854_s5 = scalar_lea.hbm %s2387_s1, 512 }
  0x11   : > { %p1634_p9 = pneg %p2122_p8  ;;  %s175_s28 = sshll.u32 %s2045_s27, 4  ;;  %s2137_s28 = int_to_ptr.vmem [resolvable:$true] %s175_s28 }
  0x12   : > { %p1855_p12 = scmp.ne.s32.totalorder %s2387_s1, %s1854_s5  ;;  %p1861_p5 = scmp.lt.u32.totalorder %s1854_s5, %s2387_s1 }
  0x13   : > { %p2133_p11 = pnand %p1634_p9, %p2391_p1 }
  0x15   : > { %p1856_p13 = pneg %p2133_p11 }
  0x17   : > { %p1857_p0 = pnand %p1856_p13, %p1855_p12 }
  0x19   : > { %p1858_p3 = pneg %p1857_p0 }
  0x1b   : > { %p1863_p7 = pnand %p1861_p5, %p1858_p3 }
  0x1d   : > { %1866 = shalt.err (!%p1863_p7)
}
  0x1e   : > { %s1867_s10 = scalar_lea.vmem %s2126_s25, 512  ;;  %p1875_p2 = scmp.lt.s32.totalorder %s2126_s25, %s2126_s25 }
  0x1f   : > { %p1868_p9 = scmp.ne.s32.totalorder %s2126_s25, %s1867_s10  ;;  %p1876_p12 = scmp.lt.s32.totalorder %s1867_s10, %s1867_s10 }
  0x21   : > { %p1870_p10 = pnand %p1868_p9, %p1856_p13  ;;  %p1877_p0 = por %p1876_p12, %p1875_p2 }
  0x23   : > { %p1871_p1 = pneg %p1870_p10 }
  0x25   : > { %p1878_p6 = pnand %p1877_p0, %p1871_p1 }
  0x27   : > { %1881 = shalt.err (!%p1878_p6)
}
  0x28   : > { %s2046_s11 = smov 64   ;;  %s2047_s12 = smov 4  }
  0x29   : > { %1637 = dma.hbm_to_vmem [thread:$0]  (!%p2133_p11), %s2387_s1, 512, %s2126_s25, [#allocation6], %s2046_s11, %s2046_s11, %s2047_s12  }
  0x2a   : > { %s1882_s27 = scalar_lea.hbm %s2388_s2, 12288 }
  0x2b   : > { %p1883_p2 = scmp.ne.s32.totalorder %s2388_s2, %s1882_s27  ;;  %p1889_p10 = scmp.lt.u32.totalorder %s1882_s27, %s2388_s2 }
  0x2d   : > { %p1885_p1 = pnand %p1883_p2, %p1856_p13 }
  0x2f   : > { %p1886_p6 = pneg %p1885_p1 }
  0x31   : > { %p1891_p3 = pnand %p1889_p10, %p1886_p6 }
  0x33   : > { %1894 = shalt.err (!%p1891_p3)
}
  0x34   : > { %s1895_s25 = scalar_lea.vmem %s2137_s28, 12288  ;;  %p1903_p12 = scmp.lt.s32.totalorder %s2137_s28, %s2137_s28 }
  0x35   : > { %p1896_p5 = scmp.ne.s32.totalorder %s2137_s28, %s1895_s25  ;;  %p1904_p0 = scmp.lt.s32.totalorder %s1895_s25, %s1895_s25 }
  0x37   : > { %p1898_p7 = pnand %p1896_p5, %p1856_p13  ;;  %p1905_p2 = por %p1904_p0, %p1903_p12 }
  0x39   : > { %p1899_p9 = pneg %p1898_p7 }
  0x3b   : > { %p1906_p1 = pnand %p1905_p2, %p1899_p9 }
  0x3d   : > { %1909 = shalt.err (!%p1906_p1)
}
  0x3e   : > { %s2048_s7 = smov 128   ;;  %s2049_s8 = smov 8  }
  0x3f   : > { %1640 = dma.hbm_to_vmem [thread:$0]  (!%p2133_p11), %s2388_s2, 12288, %s2137_s28, [#allocation6], %s2048_s7, %s2048_s7, %s2049_s8  }
  0x40   : > { %s2195_s11 = sadd.s32 1, %s2042_s18   ;;  %s32_s13 = sadd.s32 1, %s2038_s17 }
  0x41   : > { %s29_s12 = ssub.s32 %s2042_s18, %s2195_s11  ;;  %p39_p6 = scmp.ne.s32.totalorder %s2038_s17, %s2034_s16 }
  0x42   : > { %p30_p13 = scmp.eq.s32.totalorder %s29_s12, 0  ;;  %p40_p10 = scmp.eq.s32.totalorder %s2042_s18, 0 }
  0x43   : > { %p2398_p5 = scmp.eq.s32.totalorder %s2103_s19, 1  ;;  %p1654_p9 = scmp.lt.s32.totalorder %s2042_s18, 2 }
  0x44   : > { %s2204_s14 = scalar_select %p30_p13, %s2038_s17, %s32_s13  }
  0x45   : > { %p41_p3 = por %p40_p10, %p39_p6  ;;  %p2208_p7 = por %p2398_p5, %p39_p6 }
  0x46   : > { %s189_s20 = sand.u32 1, %s2038_s17   ;;  %s1596_s28 = sshll.u32 %s2042_s18, 9 }
  0x47   : > { %s2399_s26 = scalar_select %p2208_p7, 1, 0 }
  0x48   : > { %s1463_s24 = sshll.u32 %s189_s20, 5  ;;  %s2218_s30 = scalar_lea.hbm %s2386_s0, %s1596_s28 }
  0x49   : > { %s193_s5 = scalar_lea.vmem [#allocation2], %s1463_s24  ;;  %p2222_p11 = pnand %p1654_p9, %p41_p3 }
  0x4a   : > { %s201_s6 = sshll.u32 %s193_s5, 4  ;;  %s2226_s9 = scalar_lea.sflag [#allocation3], %s189_s20  ;;  %s2220_s6 = int_to_ptr.vmem [resolvable:$true] %s201_s6 }
  0x4b   : > { %s1910_s10 = scalar_lea.hbm %s2218_s30, 512  ;;  %p1912_p0 = pneg %p2222_p11 }
  0x4c   : > { %p1911_p12 = scmp.ne.s32.totalorder %s2218_s30, %s1910_s10  ;;  %s1915_s24 = scalar_lea.hbm %s2386_s0, 1024 }
  0x4d   : > { %p1916_p13 = scmp.lt.u32.totalorder %s2218_s30, %s2386_s0  ;;  %p1917_p6 = scmp.lt.u32.totalorder %s1915_s24, %s1910_s10 }
  0x4e   : > { %p1913_p2 = pnand %p1912_p0, %p1911_p12  ;;  %p1919_p3 = scmp.lt.u32.totalorder %s1910_s10, %s2218_s30 }
  0x4f   : > { %p1918_p10 = por %p1917_p6, %p1916_p13 }
  0x50   : > { %p1914_p1 = pneg %p1913_p2 }
  0x51   : > { %p1920_p5 = por %p1919_p3, %p1918_p10 }
  0x53   : > { %p1921_p9 = pnand %p1920_p5, %p1914_p1 }
  0x55   : > { %1924 = shalt.err (!%p1921_p9)
}
  0x56   : > { %s1925_s20 = scalar_lea.vmem %s2220_s6, 512  ;;  %s2050_s29 = smov [#allocation2]  }
  0x57   : > { %p1926_p12 = scmp.ne.s32.totalorder %s2220_s6, %s1925_s20  ;;  %s1930_s5 = sshll.u32 %s2050_s29, 4  ;;  %s1931_s5 = int_to_ptr.vmem [resolvable:$false] %s1930_s5 }
  0x58   : > { %s1932_s12 = scalar_lea.vmem %s1931_s5, 1024  ;;  %p1933_p4 = scmp.lt.s32.totalorder %s2220_s6, %s1931_s5 }
  0x59   : > { %p1928_p2 = pnand %p1926_p12, %p1912_p0  ;;  %p1934_p13 = scmp.lt.s32.totalorder %s1932_s12, %s1925_s20 }
  0x5b   : > { %p1929_p7 = pneg %p1928_p2  ;;  %p1935_p6 = por %p1934_p13, %p1933_p4 }
  0x5d   : > { %p1936_p10 = pnand %p1935_p6, %p1929_p7 }
  0x5f   : > { %1939 = shalt.err (!%p1936_p10)
}
  0x60   : > { %1644 = dma.hbm_to_vmem [thread:$0]  (!%p2222_p11), %s2218_s30, 512, %s2220_s6, %s2226_s9, %s2048_s7, %s2048_s7, %s2049_s8  }
  0x61   : > { %213 = sbr.rel (%p2122_p8) target bundleno = 672 (0x2a0), region = 32  ;;  %s2260_s10 = sand.u32 (!%p2122_p8), 1, %s2034_s16  }
  0x62   : > { %s1468_s13 = sshll.u32 (!%p2122_p8), %s2260_s10, 5  ;;  %s216_s24 = scalar_lea.sflag (!%p2122_p8), [#allocation3], %s2260_s10 }
  0x63   : > { %s219_s25 = scalar_lea.vmem (!%p2122_p8), [#allocation2], %s1468_s13  ;;  %p2401_p4 = scmp.ne.s32.totalorder (!%p2122_p8), %s2394_s21, 0 }
  0x68   : > { %2013 = dma.done.wait (%p2401_p4), %s216_s24, 512  }
  0x69   : > { %2015 = vsyncadd (%p2401_p4), %s216_s24, 4294966784  ;;  %p2402_p7 = scmp.eq.s32.totalorder %s2103_s19, 0 }
  0x6b   : > { %2017 = dma.done.wait (%p2402_p7), [#allocation6], 12800   ;;  %p2403_p8 = pmov %p2402_p7 }
  0x6c   : > { %v2051_v0 = vmov 0   ;;  %v1700_v1 = vld [vmem:[%s219_s25 + $0x4] ss:$8 sps:$4 sm:$0xff]   ;;  %v2274_v2 = vld [vmem:[%s219_s25] ss:$8 sps:$4 sm:$0xff]   ;;  %vm298_vm0 = vcmask 261120  }
  0x6d   : > { %2019 = vsyncadd (%p2403_p8), [#allocation6], 4294954496  ;;  %337 = vmatprep.mubr.bf16.mxu1 %v2051_v0  ;;  %305 = vmatprep.subr.bf16.mxu1 %v1700_v1  ;;  %v2276_v3 = vld [vmem:[%s219_s25 + $0x14] ss:$8 sps:$4 sm:$0xff]   ;;  %v2279_v4 = vld [vmem:[%s219_s25 + $0x10] ss:$8 sps:$4 sm:$0xff]  }
  0x6e   : > { %306 = vmatpush1.bf16.msra.mxu1 %v2274_v2  ;;  %v1706_v5 = vld [vmem:[#allocation5] sm:$0xff]   ;;  %v1713_v8 = vld [vmem:[#allocation7 + $0x14] ss:$8 sps:$4 sm:$0xff]   ;;  %v1715_v9 = vld [vmem:[#allocation7 + $0x10] ss:$8 sps:$4 sm:$0xff]   ;;  %s2298_s21 = scalar_lea.vmem [#allocation8], %s1468_s13 }
  0x6f   : > { %307 = vmatprep.subr.bf16.mxu1 %v2276_v3  ;;  %v1710_v6 = vld [vmem:[#allocation7 + $0x4] ss:$8 sps:$4 sm:$0xff]   ;;  %v1712_v7 = vld [vmem:[#allocation7] ss:$8 sps:$4 sm:$0xff]   ;;  %v1719_v13 = vld [vmem:[#allocation7 + $0x34] ss:$8 sps:$4 sm:$0xff]  }
  0x70   : > { %878 = vmatprep.subr.bf16.mxu0 %v1710_v6  ;;  %v1716_v10 = vld [vmem:[#allocation7 + $0x24] ss:$8 sps:$4 sm:$0xff]   ;;  %v1718_v12 = vld [vmem:[#allocation7 + $0x20] ss:$8 sps:$4 sm:$0xff]   ;;  %v1721_v14 = vld [vmem:[#allocation7 + $0x30] ss:$8 sps:$4 sm:$0xff]  }
  0x71   : > { %879 = vmatpush1.bf16.msra.mxu0 %v1712_v7  ;;  %v1707_v11 = vld [vmem:[#allocation5 + $0x8] sm:$0xff]   ;;  %v1708_v16 = vld [vmem:[#allocation5 + $0x10] sm:$0xff]   ;;  %v1709_v21 = vld [vmem:[#allocation5 + $0x18] sm:$0xff]   ;;  %s1320_s23 = sshll.u32 %s2298_s21, 4  ;;  %s1602_s7 = sshll.u32 %s2103_s19, 9  ;;  %s2304_s23 = int_to_ptr.vmem [resolvable:$true] %s1320_s23 }
  0x72   : > { %308 = vmatpush1.bf16.msra.mxu1 %v2279_v4  ;;  %880 = vmatprep.subr.bf16.mxu0 %v1713_v8  ;;  %v1722_v15 = vld [vmem:[#allocation7 + $0x44] ss:$8 sps:$4 sm:$0xff]   ;;  %v1724_v17 = vld [vmem:[#allocation7 + $0x40] ss:$8 sps:$4 sm:$0xff]   ;;  %v1725_v18 = vld [vmem:[#allocation7 + $0x54] ss:$8 sps:$4 sm:$0xff]   ;;  %s2309_s6 = scalar_lea.hbm %s2389_s3, %s1602_s7 }
  0x73   : > { %383 = vmatprep.subr.bf16.mxu1 %v1700_v1  ;;  %v1727_v19 = vld [vmem:[#allocation7 + $0x50] ss:$8 sps:$4 sm:$0xff]   ;;  %v1728_v20 = vld [vmem:[#allocation7 + $0x64] ss:$8 sps:$4 sm:$0xff]   ;;  %v1730_v22 = vld [vmem:[#allocation7 + $0x60] ss:$8 sps:$4 sm:$0xff]  }
  0x74   : > { %v1731_v23 = vld [vmem:[#allocation7 + $0x74] ss:$8 sps:$4 sm:$0xff]   ;;  %v1733_v24 = vld [vmem:[#allocation7 + $0x70] ss:$8 sps:$4 sm:$0xff]   ;;  %v1734_v25 = vld [vmem:[#allocation7 + $0x84] ss:$8 sps:$4 sm:$0xff]  }
  0x75   : > { %1479 = vmatmul.mubr.msk.bf16.vlgmr.msra.gmra.mrb[0].mxu1 %vm298_vm0, %v1706_v5  ;;  %881 = vmatpush1.bf16.msra.mxu0 %v1715_v9  ;;  %v1736_v26 = vld [vmem:[#allocation7 + $0x80] ss:$8 sps:$4 sm:$0xff]   ;;  %v1737_v27 = vld [vmem:[#allocation7 + $0x94] ss:$8 sps:$4 sm:$0xff]   ;;  %v1739_v28 = vld [vmem:[#allocation7 + $0x90] ss:$8 sps:$4 sm:$0xff]  }
  0x76   : > { %384 = vmatpush1.bf16.msra.mxu1 %v2274_v2  ;;  %347 = vmatprep.mubr.bf16.mxu1 %v2051_v0  ;;  %v1740_v29 = vld [vmem:[#allocation7 + $0xa4] ss:$8 sps:$4 sm:$0xff]   ;;  %v1742_v30 = vld [vmem:[#allocation7 + $0xa0] ss:$8 sps:$4 sm:$0xff]   ;;  %v1743_v31 = vld [vmem:[#allocation7 + $0xb4] ss:$8 sps:$4 sm:$0xff]  }
  0x77   : > { %385 = vmatprep.subr.bf16.mxu1 %v2276_v3  ;;  %882 = vmatprep.subr.bf16.mxu0 %v1716_v10  ;;  %v1745_v32 = vld [vmem:[#allocation7 + $0xb0] ss:$8 sps:$4 sm:$0xff]   ;;  %v1746_v33 = vld [vmem:[#allocation7 + $0xc4] ss:$8 sps:$4 sm:$0xff]   ;;  %v1748_v34 = vld [vmem:[#allocation7 + $0xc0] ss:$8 sps:$4 sm:$0xff]  }
  0x78   : > { %v1749_v35 = vld [vmem:[#allocation7 + $0xd4] ss:$8 sps:$4 sm:$0xff]   ;;  %v1751_v36 = vld [vmem:[#allocation7 + $0xd0] ss:$8 sps:$4 sm:$0xff]   ;;  %v1752_v37 = vld [vmem:[#allocation7 + $0xe4] ss:$8 sps:$4 sm:$0xff]  }
  0x79   : > { %883 = vmatpush1.bf16.msra.mxu0 %v1718_v12  ;;  %v1754_v38 = vld [vmem:[#allocation7 + $0xe0] ss:$8 sps:$4 sm:$0xff]   ;;  %v1755_v39 = vld [vmem:[#allocation7 + $0xf4] ss:$8 sps:$4 sm:$0xff]   ;;  %v1759_v40 = vld [vmem:[#allocation7 + $0x104] ss:$8 sps:$4 sm:$0xff]  }
  0x7a   : > { %386 = vmatpush1.bf16.msra.mxu1 %v2279_v4  ;;  %884 = vmatprep.subr.bf16.mxu0 %v1719_v13  ;;  %v1760_v41 = vld [vmem:[#allocation7 + $0xf0] ss:$8 sps:$4 sm:$0xff]   ;;  %v1757_v42 = vld [vmem:[#allocation7 + $0x100] ss:$8 sps:$4 sm:$0xff]   ;;  %v1763_v43 = vld [vmem:[#allocation7 + $0x204] ss:$8 sps:$4 sm:$0xff]  }
  0x7b   : > { %665 = vmatprep.subr.bf16.mxu1 %v1759_v40  ;;  %v1766_v44 = vld [vmem:[#allocation7 + $0x114] ss:$8 sps:$4 sm:$0xff]   ;;  %v1764_v45 = vld [vmem:[#allocation7 + $0x110] ss:$8 sps:$4 sm:$0xff]   ;;  %v1770_v46 = vld [vmem:[#allocation7 + $0x120] ss:$8 sps:$4 sm:$0xff]  }
  0x7c   : > { %v1772_v47 = vld [vmem:[#allocation7 + $0x124] ss:$8 sps:$4 sm:$0xff]   ;;  %v1776_v48 = vld [vmem:[#allocation7 + $0x130] ss:$8 sps:$4 sm:$0xff]   ;;  %v1778_v49 = vld [vmem:[#allocation7 + $0x134] ss:$8 sps:$4 sm:$0xff]  }
  0x7d   : > { %1480 = vmatmul.mubr.msk.bf16.gmra.mrb[4].mxu1 %vm298_vm0, %v1707_v11  ;;  %885 = vmatpush1.bf16.msra.mxu0 %v1721_v14  ;;  %v1782_v50 = vld [vmem:[#allocation7 + $0x140] ss:$8 sps:$4 sm:$0xff]   ;;  %v1784_v51 = vld [vmem:[#allocation7 + $0x144] ss:$8 sps:$4 sm:$0xff]   ;;  %v1788_v52 = vld [vmem:[#allocation7 + $0x150] ss:$8 sps:$4 sm:$0xff]  }
  0x7e   : > { %415 = vmatprep.mubr.bf16.mxu1 %v2051_v0  ;;  %886 = vmatprep.subr.bf16.mxu0 %v1722_v15  ;;  %v1790_v53 = vld [vmem:[#allocation7 + $0x154] ss:$8 sps:$4 sm:$0xff]   ;;  %v1794_v54 = vld [vmem:[#allocation7 + $0x160] ss:$8 sps:$4 sm:$0xff]   ;;  %v1796_v55 = vld [vmem:[#allocation7 + $0x164] ss:$8 sps:$4 sm:$0xff]  }
  0x7f   : > { %v1800_v56 = vld [vmem:[#allocation7 + $0x170] ss:$8 sps:$4 sm:$0xff]   ;;  %v1802_v57 = vld [vmem:[#allocation7 + $0x174] ss:$8 sps:$4 sm:$0xff]   ;;  %v1806_v58 = vld [vmem:[#allocation7 + $0x180] ss:$8 sps:$4 sm:$0xff]  }
  0x80   : > { %v1808_v59 = vld [vmem:[#allocation7 + $0x184] ss:$8 sps:$4 sm:$0xff]   ;;  %v1812_v60 = vld [vmem:[#allocation7 + $0x190] ss:$8 sps:$4 sm:$0xff]   ;;  %v1814_v61 = vld [vmem:[#allocation7 + $0x194] ss:$8 sps:$4 sm:$0xff]  }
  0x81   : > { %887 = vmatpush1.bf16.msra.mxu0 %v1724_v17  ;;  %v1818_v62 = vld [vmem:[#allocation7 + $0x1a0] ss:$8 sps:$4 sm:$0xff]   ;;  %v1820_v63 = vld [vmem:[#allocation7 + $0x1a4] ss:$8 sps:$4 sm:$0xff]   ;;  %v1836_v7 = vld [vmem:[#allocation7 + $0x1d0] ss:$8 sps:$4 sm:$0xff]  }
  0x82   : > { %888 = vmatprep.subr.bf16.mxu0 %v1725_v18  ;;  %v1830_v5 = vld [vmem:[#allocation7 + $0x1c0] ss:$8 sps:$4 sm:$0xff]   ;;  %v1832_v6 = vld [vmem:[#allocation7 + $0x1c4] ss:$8 sps:$4 sm:$0xff]   ;;  %v1838_v8 = vld [vmem:[#allocation7 + $0x1d4] ss:$8 sps:$4 sm:$0xff]  }
  0x83   : > { %v1842_v9 = vld [vmem:[#allocation7 + $0x1e0] ss:$8 sps:$4 sm:$0xff]   ;;  %v1844_v10 = vld [vmem:[#allocation7 + $0x1e4] ss:$8 sps:$4 sm:$0xff]   ;;  %v1848_v11 = vld [vmem:[#allocation7 + $0x1f0] ss:$8 sps:$4 sm:$0xff]  }
  0x84   : > { %v1850_v12 = vld [vmem:[#allocation7 + $0x1f4] ss:$8 sps:$4 sm:$0xff]   ;;  %v1799_v40 = vld [vmem:[#allocation7 + $0x264] ss:$8 sps:$4 sm:$0xff]   ;;  %s1301_s9 = scalar_lea.sflag [#allocation4], %s2260_s10  ;;  %s1940_s28 = scalar_lea.vmem %s2304_s23, 512 }
  0x85   : > { %1483 = vmatmul.mubr.msk.bf16.vlgmr.msra.gmra.mrb[8].mxu1 %vm298_vm0, %v1708_v16  ;;  %889 = vmatpush1.bf16.msra.mxu0 %v1727_v19  ;;  %v1761_v19 = vld [vmem:[#allocation7 + $0x200] ss:$8 sps:$4 sm:$0xff]   ;;  %p1941_p11 = scmp.ne.s32.totalorder %s2304_s23, %s1940_s28  ;;  %p2404_p0 = scmp.ne.s32.totalorder %s2399_s26, 0 }
  0x86   : > { %425 = vmatprep.mubr.bf16.mxu1 %v2051_v0  ;;  %890 = vmatprep.subr.bf16.mxu0 %v1728_v20  ;;  %v1824_v0 = vld [vmem:[#allocation7 + $0x1b0] ss:$8 sps:$4 sm:$0xff]   ;;  %v1769_v20 = vld [vmem:[#allocation7 + $0x214] ss:$8 sps:$4 sm:$0xff]   ;;  %s2052_s27 = smov [#allocation8]  }
  0x87   : > { %666 = vmatpush1.bf16.msra.mxu1 %v1757_v42  ;;  %p1942_p1 = pnand %p1941_p11, %p2404_p0  ;;  %s1944_s20 = sshll.u32 %s2052_s27, 4  ;;  %s1945_s20 = int_to_ptr.vmem [resolvable:$false] %s1944_s20 }
  0x88   : > { %667 = vmatprep.subr.bf16.mxu1 %v1766_v44  ;;  %s1946_s29 = scalar_lea.vmem %s1945_s20, 1024  ;;  %p1947_p5 = scmp.lt.s32.totalorder %s2304_s23, %s1945_s20 }
  0x89   : > { %891 = vmatpush1.bf16.msra.mxu0 %v1730_v22  ;;  %p1943_p3 = pneg %p1942_p1  ;;  %p1948_p9 = scmp.lt.s32.totalorder %s1946_s29, %s1940_s28 }
  0x8a   : > { %892 = vmatprep.subr.bf16.mxu0 %v1731_v23  ;;  %v1775_v23 = vld [vmem:[#allocation7 + $0x224] ss:$8 sps:$4 sm:$0xff]  }
  0x8b   : > { %668 = vmatpush1.bf16.msra.mxu1 %v1764_v45  ;;  %v1797_v45 = vld [vmem:[#allocation7 + $0x260] ss:$8 sps:$4 sm:$0xff]   ;;  %p1949_p12 = por %p1948_p9, %p1947_p5 }
  0x8c   : > { %669 = vmatprep.subr.bf16.mxu1 %v1772_v47  ;;  %v1805_v47 = vld [vmem:[#allocation7 + $0x274] ss:$8 sps:$4 sm:$0xff]  }
  0x8d   : > { %1484 = vmatmul.mubr.msk.bf16.gmra.mrb[12].mxu1 %vm298_vm0, %v1709_v21  ;;  %893 = vmatpush1.bf16.msra.mxu0 %v1733_v24  ;;  %v1767_v21 = vld [vmem:[#allocation7 + $0x210] ss:$8 sps:$4 sm:$0xff]   ;;  %p1950_p2 = pnand %p1949_p12, %p1943_p3 }
  0x8e   : > { %697 = vmatprep.mubr.bf16.mxu1 %v1700_v1  ;;  %894 = vmatprep.subr.bf16.mxu0 %v1734_v25  ;;  %v1826_v1 = vld [vmem:[#allocation7 + $0x1b4] ss:$8 sps:$4 sm:$0xff]  }
  0x8f   : > { %670 = vmatpush1.bf16.msra.mxu1 %v1770_v46 }
  0x90   : > { %671 = vmatprep.subr.bf16.mxu1 %v1778_v49  ;;  %v1811_v49 = vld [vmem:[#allocation7 + $0x284] ss:$8 sps:$4 sm:$0xff]  }
  0x91   : > { %895 = vmatpush1.bf16.msra.mxu0 %v1736_v26 }
  0x92   : > { %896 = vmatprep.subr.bf16.mxu0 %v1737_v27  ;;  %v1781_v27 = vld [vmem:[#allocation7 + $0x234] ss:$8 sps:$4 sm:$0xff]  }
  0x93   : > { %672 = vmatpush1.bf16.msra.mxu1 %v1776_v48  ;;  %v1803_v48 = vld [vmem:[#allocation7 + $0x270] ss:$8 sps:$4 sm:$0xff]  }
  0x94   : > { %673 = vmatprep.subr.bf16.mxu1 %v1784_v51  ;;  %v1817_v51 = vld [vmem:[#allocation7 + $0x294] ss:$8 sps:$4 sm:$0xff]  }
  0x95   : > { %897 = vmatpush1.bf16.msra.mxu0 %v1739_v28  ;;  %v1779_v28 = vld [vmem:[#allocation7 + $0x230] ss:$8 sps:$4 sm:$0xff]  }
  0x96   : > { %898 = vmatprep.subr.bf16.mxu0 %v1740_v29 }
  0x97   : > { %674 = vmatpush1.bf16.msra.mxu1 %v1782_v50  ;;  %v1809_v50 = vld [vmem:[#allocation7 + $0x280] ss:$8 sps:$4 sm:$0xff]  }
  0x98   : > { %675 = vmatprep.subr.bf16.mxu1 %v1790_v53  ;;  %v1823_v53 = vld [vmem:[#allocation7 + $0x2a4] ss:$8 sps:$4 sm:$0xff]  }
  0x99   : > { %899 = vmatpush1.bf16.msra.mxu0 %v1742_v30  ;;  %v1787_v30 = vld [vmem:[#allocation7 + $0x244] ss:$8 sps:$4 sm:$0xff]  }
  0x9a   : > { %900 = vmatprep.subr.bf16.mxu0 %v1743_v31 }
  0x9b   : > { %676 = vmatpush1.bf16.msra.mxu1 %v1788_v52  ;;  %v1815_v52 = vld [vmem:[#allocation7 + $0x290] ss:$8 sps:$4 sm:$0xff]  }
  0x9c   : > { %677 = vmatprep.subr.bf16.mxu1 %v1796_v55  ;;  %v1829_v55 = vld [vmem:[#allocation7 + $0x2b4] ss:$8 sps:$4 sm:$0xff]  }
  0x9d   : > { %901 = vmatpush1.bf16.msra.mxu0 %v1745_v32 }
  0x9e   : > { %902 = vmatprep.subr.bf16.mxu0 %v1746_v33 }
  0x9f   : > { %678 = vmatpush1.bf16.msra.mxu1 %v1794_v54  ;;  %v1821_v54 = vld [vmem:[#allocation7 + $0x2a0] ss:$8 sps:$4 sm:$0xff]  }
  0xa0   : > { %679 = vmatprep.subr.bf16.mxu1 %v1802_v57  ;;  %v1835_v57 = vld [vmem:[#allocation7 + $0x2c4] ss:$8 sps:$4 sm:$0xff]  }
  0xa1   : > { %903 = vmatpush1.bf16.msra.mxu0 %v1748_v34 }
  0xa2   : > { %904 = vmatprep.subr.bf16.mxu0 %v1749_v35  ;;  %v1785_v35 = vld [vmem:[#allocation7 + $0x240] ss:$8 sps:$4 sm:$0xff]  }
  0xa3   : > { %680 = vmatpush1.bf16.msra.mxu1 %v1800_v56  ;;  %v1827_v56 = vld [vmem:[#allocation7 + $0x2b0] ss:$8 sps:$4 sm:$0xff]  }
  0xa4   : > { %681 = vmatprep.subr.bf16.mxu1 %v1808_v59  ;;  %v1841_v59 = vld [vmem:[#allocation7 + $0x2d4] ss:$8 sps:$4 sm:$0xff]  }
  0xa5   : > { %905 = vmatpush1.bf16.msra.mxu0 %v1751_v36 }
  0xa6   : > { %906 = vmatprep.subr.bf16.mxu0 %v1752_v37  ;;  %v1793_v37 = vld [vmem:[#allocation7 + $0x254] ss:$8 sps:$4 sm:$0xff]  }
  0xa7   : > { %682 = vmatpush1.bf16.msra.mxu1 %v1806_v58  ;;  %v1833_v58 = vld [vmem:[#allocation7 + $0x2c0] ss:$8 sps:$4 sm:$0xff]  }
  0xa8   : > { %683 = vmatprep.subr.bf16.mxu1 %v1814_v61  ;;  %v1847_v61 = vld [vmem:[#allocation7 + $0x2e4] ss:$8 sps:$4 sm:$0xff]  }
  0xa9   : > { %907 = vmatpush1.bf16.msra.mxu0 %v1754_v38  ;;  %v1791_v38 = vld [vmem:[#allocation7 + $0x250] ss:$8 sps:$4 sm:$0xff]  }
  0xaa   : > { %908 = vmatprep.subr.bf16.mxu0 %v1755_v39 }
  0xab   : > { %684 = vmatpush1.bf16.msra.mxu1 %v1812_v60  ;;  %v1839_v60 = vld [vmem:[#allocation7 + $0x2d0] ss:$8 sps:$4 sm:$0xff]  }
  0xac   : > { %685 = vmatprep.subr.bf16.mxu1 %v1820_v63  ;;  %v1853_v63 = vld [vmem:[#allocation7 + $0x2f4] ss:$8 sps:$4 sm:$0xff]  }
  0xad   : > { %909 = vmatpush1.bf16.msra.mxu0 %v1760_v41 }
  0xae   : > { %1124 = vmatprep.subr.bf16.mxu0 %v1763_v43 }
  0xaf   : > { %686 = vmatpush1.bf16.msra.mxu1 %v1818_v62  ;;  %v1845_v62 = vld [vmem:[#allocation7 + $0x2e0] ss:$8 sps:$4 sm:$0xff]  }
  0xb0   : > { %687 = vmatprep.subr.bf16.mxu1 %v1826_v1 }
  0xb3   : > { %688 = vmatpush1.bf16.msra.mxu1 %v1824_v0  ;;  %v1851_v0 = vld [vmem:[#allocation7 + $0x2f0] ss:$8 sps:$4 sm:$0xff]  }
  0xb4   : > { %689 = vmatprep.subr.bf16.mxu1 %v1832_v6 }
  0xb7   : > { %690 = vmatpush1.bf16.msra.mxu1 %v1830_v5 }
  0xb8   : > { %691 = vmatprep.subr.bf16.mxu1 %v1838_v8 }
  0xbb   : > { %692 = vmatpush1.bf16.msra.mxu1 %v1836_v7 }
  0xbc   : > { %693 = vmatprep.subr.bf16.mxu1 %v1844_v10 }
  0xbf   : > { %694 = vmatpush1.bf16.msra.mxu1 %v1842_v9 }
  0xc0   : > { %695 = vmatprep.subr.bf16.mxu1 %v1850_v12 }
  0xc3   : > { %696 = vmatpush1.bf16.msra.mxu1 %v1848_v11 }
  0xc6   : > { %698 = vmatmul.mubr.bf16.vlgmr.msra.gmra.mrb[16].mxu1 %v2274_v2 }
  0xc7   : > { %707 = vmatprep.mubr.bf16.mxu1 %v2276_v3 }
  0xce   : > { %708 = vmatmul.mubr.bf16.gmra.mrb[20].mxu1 %v2279_v4  ;;  %v1773_v4 = vld [vmem:[#allocation7 + $0x220] ss:$8 sps:$4 sm:$0xff]  }
 0x148   : > { %v339_v13 = vpop.f32.mrb[0].mxu1 }
 0x149   : > { %v341_v14 = vpop.f32.mrb[1].mxu1 }
 0x14a   : > { %v343_v15 = vpop.f32.mrb[2].mxu1 }
 0x14b   : > { %v358_v16 = vpack.c.bf16 %v343_v15, %v339_v13  ;;  %v345_v17 = vpop.f32.mrb[3].mxu1 }
 0x14c   : > { %v359_v18 = vpack.c.bf16 %v345_v17, %v341_v14 }
 0x14e   : > { %910 = vmatprep.mubr.bf16.mxu0 %v359_v18 }
 0x14f   : > { %911 = vmatmul.mubr.bf16.vlgmr.msra.gmra.mrb[0].mxu0 %v358_v16 }
 0x150   : > { %1125 = vmatpush1.bf16.msra.mxu0 %v1761_v19  ;;  %v349_v22 = vpop.f32.mrb[4].mxu1 }
 0x151   : > { %1126 = vmatprep.subr.bf16.mxu0 %v1769_v20  ;;  %v351_v2 = vpop.f32.mrb[5].mxu1 }
 0x152   : > { %v353_v24 = vpop.f32.mrb[6].mxu1 }
 0x153   : > { %v360_v3 = vpack.c.bf16 %v353_v24, %v349_v22  ;;  %v355_v25 = vpop.f32.mrb[7].mxu1 }
 0x154   : > { %1127 = vmatpush1.bf16.msra.mxu0 %v1767_v21  ;;  %v361_v26 = vpack.c.bf16 %v355_v25, %v351_v2 }
 0x155   : > { %1128 = vmatprep.subr.bf16.mxu0 %v1775_v23 }
 0x156   : > { %920 = vmatprep.mubr.bf16.mxu0 %v361_v26 }
 0x157   : > { %921 = vmatmul.mubr.bf16.gmra.mrb[4].mxu0 %v360_v3 }
 0x158   : > { %1129 = vmatpush1.bf16.msra.mxu0 %v1773_v4  ;;  %v2293_v29 = vpop.f32.mrb[8].mxu1 }
 0x159   : > { %1130 = vmatprep.subr.bf16.mxu0 %v1781_v27  ;;  %v419_v31 = vpop.f32.mrb[9].mxu1 }
 0x15a   : > { %v421_v32 = vpop.f32.mrb[10].mxu1 }
 0x15b   : > { %v436_v33 = vpack.c.bf16 %v421_v32, %v2293_v29  ;;  %v423_v34 = vpop.f32.mrb[11].mxu1 }
 0x15c   : > { %1131 = vmatpush1.bf16.msra.mxu0 %v1779_v28  ;;  %v437_v36 = vpack.c.bf16 %v423_v34, %v419_v31 }
 0x15d   : > { %1132 = vmatprep.subr.bf16.mxu0 %v1787_v30 }
 0x15e   : > { %1156 = vmatprep.mubr.bf16.mxu0 %v437_v36 }
 0x160   : > { %1133 = vmatpush1.bf16.msra.mxu0 %v1785_v35  ;;  %v427_v39 = vpop.f32.mrb[12].mxu1 }
 0x161   : > { %1134 = vmatprep.subr.bf16.mxu0 %v1793_v37  ;;  %v429_v41 = vpop.f32.mrb[13].mxu1 }
 0x162   : > { %v431_v42 = vpop.f32.mrb[14].mxu1 }
 0x163   : > { %v438_v43 = vpack.c.bf16 %v431_v42, %v427_v39  ;;  %v433_v44 = vpop.f32.mrb[15].mxu1 }
 0x164   : > { %1135 = vmatpush1.bf16.msra.mxu0 %v1791_v38  ;;  %v439_v46 = vpack.c.bf16 %v433_v44, %v429_v41 }
 0x165   : > { %1136 = vmatprep.subr.bf16.mxu0 %v1799_v40 }
 0x168   : > { %1137 = vmatpush1.bf16.msra.mxu0 %v1797_v45 }
 0x169   : > { %1138 = vmatprep.subr.bf16.mxu0 %v1805_v47 }
 0x16c   : > { %1139 = vmatpush1.bf16.msra.mxu0 %v1803_v48 }
 0x16d   : > { %1140 = vmatprep.subr.bf16.mxu0 %v1811_v49 }
 0x170   : > { %1141 = vmatpush1.bf16.msra.mxu0 %v1809_v50 }
 0x171   : > { %1142 = vmatprep.subr.bf16.mxu0 %v1817_v51 }
 0x174   : > { %1143 = vmatpush1.bf16.msra.mxu0 %v1815_v52 }
 0x175   : > { %1144 = vmatprep.subr.bf16.mxu0 %v1823_v53 }
 0x178   : > { %1145 = vmatpush1.bf16.msra.mxu0 %v1821_v54 }
 0x179   : > { %1146 = vmatprep.subr.bf16.mxu0 %v1829_v55 }
 0x17c   : > { %1147 = vmatpush1.bf16.msra.mxu0 %v1827_v56 }
 0x17d   : > { %1148 = vmatprep.subr.bf16.mxu0 %v1835_v57 }
 0x180   : > { %1149 = vmatpush1.bf16.msra.mxu0 %v1833_v58 }
 0x181   : > { %1150 = vmatprep.subr.bf16.mxu0 %v1841_v59 }
 0x184   : > { %1151 = vmatpush1.bf16.msra.mxu0 %v1839_v60 }
 0x185   : > { %1152 = vmatprep.subr.bf16.mxu0 %v1847_v61 }
 0x188   : > { %1153 = vmatpush1.bf16.msra.mxu0 %v1845_v62 }
 0x189   : > { %1154 = vmatprep.subr.bf16.mxu0 %v1853_v63 }
 0x18c   : > { %1155 = vmatpush1.bf16.msra.mxu0 %v1851_v0 }
 0x18f   : > { %1157 = vmatmul.mubr.bf16.vlgmr.msra.gmra.mrb[0].mxu0 %v436_v33 }
 0x190   : > { %1166 = vmatprep.mubr.bf16.mxu0 %v439_v46 }
 0x197   : > { %1167 = vmatmul.mubr.bf16.gmra.mrb[4].mxu0 %v438_v43 }
 0x199   : > { %v699_v1 = vpop.f32.mrb[16].mxu1 }
 0x19a   : > { %v701_v5 = vpop.f32.mrb[17].mxu1 }
 0x19b   : > { %v703_v6 = vpop.f32.mrb[18].mxu1 }
 0x19c   : > { %v705_v7 = vpop.f32.mrb[19].mxu1 }
 0x1a1   : > { %v709_v8 = vpop.f32.mrb[20].mxu1 }
 0x1a2   : > { %v711_v9 = vpop.f32.mrb[21].mxu1 }
 0x1a3   : > { %v713_v10 = vpop.f32.mrb[22].mxu1 }
 0x1a4   : > { %v715_v11 = vpop.f32.mrb[23].mxu1 }
 0x262   : > { %v1158_v12 = vpop.f32.mrb[0].mxu0 }
 0x263   : > { %v1604_v13 = vadd.f32 %v1158_v12, %v699_v1  ;;  %v1160_v14 = vpop.f32.mrb[1].mxu0 }
 0x264   : > { %v1605_v15 = vadd.f32 %v1160_v14, %v701_v5  ;;  %v1162_v16 = vpop.f32.mrb[2].mxu0 }
 0x265   : > { %v1606_v17 = vadd.f32 %v1162_v16, %v703_v6  ;;  %v1164_v18 = vpop.f32.mrb[3].mxu0  ;;  %v1226_v21 = vmul.f32 %v1604_v13, %v1604_v13 }
 0x266   : > { %v1597_v19 = vpack.c.bf16 %v1605_v15, %v1604_v13  ;;  %v1607_v20 = vadd.f32 %v1164_v18, %v705_v7  ;;  %v1227_v2 = vmul.f32 %v1605_v15, %v1605_v15 }
 0x267   : > { %v1185_v22 = vadd.f32 %v1606_v17, %v1604_v13  ;;  %v1228_v23 = vmul.f32 %v1606_v17, %v1606_v17 }
 0x268   : > { %1296 = vst [vmem:[%s2298_s21] sm:$0xff] %v1597_v19  ;;  %v1194_v24 = vadd.f32 %v1607_v20, %v1605_v15  ;;  %v1229_v3 = vmul.f32 %v1607_v20, %v1607_v20  ;;  %v1598_v25 = vpack.c.bf16 %v1607_v20, %v1606_v17 }
 0x269   : > { %v1234_v4 = vadd.f32 %v1228_v23, %v1226_v21 }
 0x26a   : > { %v1243_v26 = vadd.f32 %v1229_v3, %v1227_v2  ;;  %1297 = vst [vmem:[%s2298_s21 + $0x8] sm:$0xff] %v1598_v25  ;;  %v1168_v27 = vpop.f32.mrb[4].mxu0 }
 0x26b   : > { %v1608_v28 = vadd.f32 %v1168_v27, %v709_v8  ;;  %v1170_v29 = vpop.f32.mrb[5].mxu0 }
 0x26c   : > { %v1609_v30 = vadd.f32 %v1170_v29, %v711_v9  ;;  %v1172_v31 = vpop.f32.mrb[6].mxu0 }
 0x26d   : > { %v1186_v32 = vadd.f32 %v1608_v28, %v1185_v22  ;;  %v1230_v33 = vmul.f32 %v1608_v28, %v1608_v28  ;;  %v1610_v34 = vadd.f32 %v1172_v31, %v713_v10  ;;  %v1174_v35 = vpop.f32.mrb[7].mxu0 }
 0x26e   : > { %v1195_v36 = vadd.f32 %v1609_v30, %v1194_v24  ;;  %v1231_v37 = vmul.f32 %v1609_v30, %v1609_v30  ;;  %v1599_v38 = vpack.c.bf16 %v1609_v30, %v1608_v28  ;;  %v1611_v39 = vadd.f32 %v1174_v35, %v715_v11 }
 0x26f   : > { %v1235_v40 = vadd.f32 %v1234_v4, %v1230_v33  ;;  %v1187_v41 = vadd.f32 %v1610_v34, %v1186_v32  ;;  %v1232_v42 = vmul.f32 %v1610_v34, %v1610_v34 }
 0x270   : > { %v1244_v43 = vadd.f32 %v1243_v26, %v1231_v37  ;;  %1298 = vst [vmem:[%s2298_s21 + $0x10] sm:$0xff] %v1599_v38  ;;  %v1196_v44 = vadd.f32 %v1611_v39, %v1195_v36  ;;  %v1233_v45 = vmul.f32 %v1611_v39, %v1611_v39  ;;  %v1600_v46 = vpack.c.bf16 %v1611_v39, %v1610_v34 }
 0x271   : > { %v1188_v47 = vrot.slane %v1187_v41, 4  ;;  %v1236_v48 = vadd.f32 %v1235_v40, %v1232_v42 }
 0x272   : > { %v1197_v49 = vrot.slane %v1196_v44, 4  ;;  %v1245_v50 = vadd.f32 %v1244_v43, %v1233_v45  ;;  %1299 = vst [vmem:[%s2298_s21 + $0x18] sm:$0xff] %v1600_v46 }
 0x273   : > { %v1189_v51 = vadd.f32 %v1188_v47, %v1187_v41  ;;  %v1237_v52 = vrot.slane %v1236_v48, 4 }
 0x274   : > { %1953 = shalt.err (!%p1950_p2)
}
 0x275   : > { %s1954_s5 = scalar_lea.hbm %s2309_s6, 512  ;;  %s1958_s24 = scalar_lea.hbm %s2389_s3, 1024 }
 0x276   : > { %p1955_p13 = scmp.ne.s32.totalorder %s2309_s6, %s1954_s5  ;;  %p1959_p4 = scmp.lt.u32.totalorder %s2309_s6, %s2389_s3 }
 0x277   : > { %p1960_p7 = scmp.lt.u32.totalorder %s1958_s24, %s1954_s5  ;;  %p1962_p11 = scmp.lt.u32.totalorder %s1954_s5, %s2309_s6 }
 0x278   : > { %p1956_p6 = pnand %p1955_p13, %p2404_p0 }
 0x279   : > { %p1961_p8 = por %p1960_p7, %p1959_p4 }
 0x27a   : > { %p1957_p10 = pneg %p1956_p6 }
 0x27b   : > { %p1963_p1 = por %p1962_p11, %p1961_p8 }
 0x27d   : > { %p1964_p3 = pnand %p1963_p1, %p1957_p10 }
 0x27f   : > { %1967 = shalt.err (!%p1964_p3)
}
 0x280   : > { %s2053_s7 = smov 128   ;;  %s2054_s8 = smov 8   ;;  %v1198_v53 = vadd.f32 %v1197_v49, %v1196_v44  ;;  %v1246_v54 = vrot.slane %v1245_v50, 4  ;;  %v2055_v55 = vmov 1966171168   ;;  %v1209_v57 = vlaneseq }
 0x281   : > { %1630 = dma.vmem_to_hbm [thread:$0]  (%p2404_p0), %s2304_s23, 512, %s2309_s6, %s1301_s9, %s2053_s7, %s2053_s7, %s2054_s8   ;;  %v1207_v56 = vunpack.c.l.s4 %v2055_v55  ;;  %v1190_v58 = vrot.slane %v1189_v51, 2  ;;  %v1238_v59 = vadd.f32 %v1237_v52, %v1236_v48 }
 0x282   : > { %v1199_v60 = vrot.slane %v1198_v53, 2  ;;  %v1247_v61 = vadd.f32 %v1246_v54, %v1245_v50  ;;  %v1210_v6 = vshrl.u32 %v1209_v57, 7  ;;  %s1472_s23 = sshll.u32 %s2260_s10, 2  ;;  %vm1223_vm1 = vcmp.lt.s32.totalorder %v1209_v57, 256  ;;  %s1603_s30 = sshll.u32 %s2103_s19, 6 }
 0x283   : > { %v1191_v62 = vadd.f32 %v1190_v58, %v1189_v51  ;;  %v1239_v63 = vrot.slane %v1238_v59, 2  ;;  %v1208_v5 = vunpack.c.0.s8 %v1207_v56  ;;  %s256_s6 = scalar_lea.vmem [#allocation9], %s1472_s23  ;;  %s2342_s20 = scalar_lea.hbm %s2390_s4, %s1603_s30 }
 0x284   : > { %v1200_v0 = vadd.f32 %v1199_v60, %v1198_v53  ;;  %v1248_v1 = vrot.slane %v1247_v61, 2  ;;  %s1337_s9 = sshll.u32 %s256_s6, 4  ;;  %s1306_s29 = scalar_lea.sflag [#allocation10], %s2260_s10  ;;  %s2344_s9 = int_to_ptr.vmem [resolvable:$true] %s1337_s9 }
 0x285   : > { %v1192_v7 = vrot.slane %v1191_v62, 1  ;;  %v1240_v8 = vadd.f32 %v1239_v63, %v1238_v59  ;;  %v1211_v15 = vsub.s32 %v1208_v5, %v1210_v6  ;;  %s1968_s5 = scalar_lea.vmem %s2344_s9, 64  ;;  %s2056_s19 = smov [#allocation9]  }
 0x286   : > { %v1201_v9 = vrot.slane %v1200_v0, 1  ;;  %v1249_v10 = vadd.f32 %v1248_v1, %v1247_v61  ;;  %p1969_p5 = scmp.ne.s32.totalorder %s2344_s9, %s1968_s5  ;;  %s1972_s12 = sshll.u32 %s2056_s19, 4  ;;  %s1973_s12 = int_to_ptr.vmem [resolvable:$false] %s1972_s12 }
 0x287   : > { %v1193_v11 = vadd.f32 %v1192_v7, %v1191_v62  ;;  %v1241_v12 = vrot.slane %v1240_v8, 1  ;;  %s1974_s13 = scalar_lea.vmem %s1973_s12, 128  ;;  %p1975_p2 = scmp.lt.s32.totalorder %s2344_s9, %s1973_s12 }
 0x288   : > { %v1202_v13 = vadd.f32 %v1201_v9, %v1200_v0  ;;  %v1250_v14 = vrot.slane %v1249_v10, 1  ;;  %p1970_p9 = pnand %p1969_p5, %p2404_p0  ;;  %p1976_p13 = scmp.lt.s32.totalorder %s1974_s13, %s1968_s5 }
 0x289   : > { %v1242_v16 = vadd.f32 %v1241_v12, %v1240_v8 }
 0x28a   : > { %v1205_v17 = vcombine.low %v1193_v11, %v1202_v13  ;;  %v1251_v18 = vadd.f32 %v1250_v14, %v1249_v10  ;;  %p1971_p12 = pneg %p1970_p9  ;;  %p1977_p6 = por %p1976_p13, %p1975_p2 }
 0x28c   : > { %v1254_v19 = vcombine.low %v1242_v16, %v1251_v18  ;;  %v1212_v20 = vrot.slane %v1205_v17, %v1211_v15  ;;  %p1978_p10 = pnand %p1977_p6, %p1971_p12 }
 0x28e   : > { %v1219_v21 = vrot.slane %v1212_v20, %v1211_v15  ;;  %v1261_v22 = vrot.slane %v1254_v19, %v1211_v15 }
 0x290   : > { %1225 = vst.msk [vmem:[%s256_s6] ss:$2 sm:$0x3] %vm1223_vm1, %v1219_v21  ;;  %v1268_v23 = vrot.slane %v1261_v22, %v1211_v15 }
 0x292   : > { %1581 = vst.msk [vmem:[%s256_s6 + $0x1] ss:$2 sm:$0x3] %vm1223_vm1, %v1268_v23 }
 0x293   : > { %1981 = shalt.err (!%p1978_p10)
}
 0x294   : > { %s1982_s10 = scalar_lea.hbm %s2342_s20, 64  ;;  %s1986_s21 = scalar_lea.hbm %s2390_s4, 128 }
 0x295   : > { %p1983_p4 = scmp.ne.s32.totalorder %s2342_s20, %s1982_s10  ;;  %p1987_p11 = scmp.lt.u32.totalorder %s2342_s20, %s2390_s4 }
 0x296   : > { %p1988_p1 = scmp.lt.u32.totalorder %s1986_s21, %s1982_s10  ;;  %p1990_p5 = scmp.lt.u32.totalorder %s1982_s10, %s2342_s20 }
 0x297   : > { %p1984_p7 = pnand %p1983_p4, %p2404_p0 }
 0x298   : > { %p1989_p3 = por %p1988_p1, %p1987_p11 }
 0x299   : > { %p1985_p8 = pneg %p1984_p7 }
 0x29a   : > { %p1991_p9 = por %p1990_p5, %p1989_p3 }
 0x29c   : > { %p1992_p12 = pnand %p1991_p9, %p1985_p8 }
 0x29e   : > { %1995 = shalt.err (!%p1992_p12)
}
 0x29f   : > { %1631 = dma.vmem_to_hbm [thread:$0]  (%p2404_p0), %s2344_s9, 64, %s2342_s20, %s1306_s29  }
 0x2a0 PF: > { %s1349_s23 = sand.u32 1, %s2030_s15   ;;  %p2405_p2 = scmp.ne.s32.totalorder %s2395_s22, 0 }
 0x2a1   : > { %p2406_p13 = scmp.ge.s32.totalorder %s2042_s18, 2  ;;  %s1350_s30 = scalar_lea.sflag [#allocation4], %s1349_s23 }
 0x2a3   : > { %p1646_p6 = pnand %p2406_p13, %p2405_p2 }
 0x2a5   : > { %2021 = dma.done.wait (!%p1646_p6), %s1350_s30, 512  }
 0x2a6   : > { %2023 = vsyncadd (!%p1646_p6), %s1350_s30, 4294966784  ;;  %s1359_s6 = scalar_lea.sflag [#allocation10], %s1349_s23 }
 0x2a7   : > { %2025 = dma.done.wait (!%p1646_p6), %s1359_s6, 64  }
 0x2a8   : > { %2027 = vsyncadd (!%p1646_p6), %s1359_s6, 4294967232  ;;  %p22_p0 = scmp.ge.s32.totalorder %s2195_s11, 4   ;;  %s2407_s15 = smov %s2034_s16 }
 0x2a9   : > { %s2408_s16 = smov %s2038_s17  ;;  %s2409_s17 = smov %s2204_s14 }
 0x2aa   : > { %s2410_s18 = smov %s2195_s11  ;;  %24 = sbr.rel (!%p22_p0) target bundleno = 8 (0x8), region = 106 }
 0x2b1   :  { %1364 = vsyncpa [#allocation3], 1 }
 0x2b2   :  { %1366 = vsyncpa [#allocation3 + $0x1], 1 }
 0x2b3   :  { %1367 = vsyncpa [#allocation6], 1 }
 0x2b4   :  { %1368 = vsyncpa [#allocation4], 1 }
 0x2b5   :  { %1370 = vsyncpa [#allocation4 + $0x1], 1 }
 0x2b6   :  { %1371 = vsyncpa [#allocation10], 1 }
 0x2b7   :  { %1373 = vsyncpa [#allocation10 + $0x1], 1 }

</bundles_post_ra>
